<compile_context>
chip_gen: v5e
topology: v5e:2x2
jax: 0.10.0
libtpu: 0.0.40
codegen_flags: <defaults>
</compile_context>

<pallas_src>
from functools import partial

import numpy as np
import jax
import jax.numpy as jnp
from jax.experimental import pallas as pl
from jax.experimental.pallas import tpu as pltpu
from scipy.optimize import linear_sum_assignment


def _round_up(x: int, m: int) -> int:
    return ((x + m - 1) // m) * m


# ---------------------------------------------------------------------------
# Pallas kernel: one (TM, TN) tile of the fused pairwise-Euclidean cost matrix
# ---------------------------------------------------------------------------
def _make_cost_kernel(w_kd: float, w_posori: float, dp: int):
    def cost_kernel(oe_ref, teT_ref, op_ref, tpT_ref, c_ref):
        c = None

        if w_kd != 0.0:
            # Augmented operands: oe_aug = [-2*oe | oe^2 | 1]  (TM, De+2)
            #                     teT_aug = [te^T ; 1 ; te^2]  (De+2, TN)
            # so a single MXU pass yields ||x||^2 + ||y||^2 - 2 x.y directly;
            # K grows De -> De+2 (free on a 128/256-wide systolic pass) and the
            # norm adds leave the VPU entirely.
            d2 = jnp.dot(oe_ref[...], teT_ref[...],
                         preferred_element_type=jnp.float32)
            c = w_kd * jnp.sqrt(jnp.maximum(d2, 0.0))

        if w_posori != 0.0:
            # Dp is 2 or 3: keep this off the MXU — a K=3 contraction pads the
            # systolic pass with zeros.  Unrolled VPU FMAs instead.
            op = op_ref[...]      # (TM, Dp)
            tpT = tpT_ref[...]    # (Dp, TN)
            diff0 = op[:, 0:1] - tpT[0:1, :]
            d2p = diff0 * diff0
            for d in range(1, dp):
                diff = op[:, d:d + 1] - tpT[d:d + 1, :]   # (TM,1)-(1,TN) bcast
                d2p = d2p + diff * diff
            term = w_posori * jnp.sqrt(d2p)
            c = term if c is None else c + term

        c_ref[...] = c

    return cost_kernel


# ---------------------------------------------------------------------------
# Tiled, batched pairwise cost (per-batch block diagonal only).
# Fully jitted: pad / transpose / concat fuse with the pallas_call, and the
# padded output is sliced to the valid region on device before any D2H copy.
# ---------------------------------------------------------------------------
@partial(jax.jit, static_argnames=("w_kd", "w_posori"))
def batched_pairwise_cost(out_embs, tgt_embs, out_posori, tgt_posori,
                          *, w_kd: float, w_posori: float):
    """Returns C of shape (bs, num_queries, max_mnt) float32; caller still
    slices each batch to its valid :num_mnt[b] columns before assignment."""
    out_embs = jnp.asarray(out_embs, jnp.float32)      # (bs, N, De)
    tgt_embs = jnp.asarray(tgt_embs, jnp.float32)      # (bs, M, De)
    out_posori = jnp.asarray(out_posori, jnp.float32)  # (bs, N, Dp)
    tgt_posori = jnp.asarray(tgt_posori, jnp.float32)  # (bs, M, Dp)

    bs, N, De = out_embs.shape
    M = tgt_embs.shape[1]
    Dp = out_posori.shape[2]

    # Static, sublane/lane-aligned padding: N -> mult of 8, M -> mult of 128.
    # Lane-dense output last dim => unmasked vst; static shapes => no recompile
    # for every distinct number of targets.
    n_pad = _round_up(max(N, 8), 8)
    TM = n_pad if n_pad <= 512 else 512
    n_pad = _round_up(n_pad, TM)
    m_pad = _round_up(max(M, 1), 128)
    TN = m_pad if m_pad <= 1024 else 1024      # bigger TN: fewer grid steps,
    m_pad = _round_up(m_pad, TN)               # teT stays tiny vs. the out tile

    # v7x has 2 TensorCores: if bs == 1 and the whole problem is one grid step,
    # split a tile so both cores get work (costs nothing on v5e/v6e).
    if bs == 1 and (n_pad // TM) * (m_pad // TN) == 1:
        if TN >= 256 and TN % 256 == 0:
            TN //= 2
        elif TM >= 16 and TM % 16 == 0:
            TM //= 2

    oe = jnp.pad(out_embs, ((0, 0), (0, n_pad - N), (0, 0)))
    op = jnp.pad(out_posori, ((0, 0), (0, n_pad - N), (0, 0)))
    te = jnp.pad(tgt_embs, ((0, 0), (0, m_pad - M), (0, 0)))
    tp = jnp.pad(tgt_posori, ((0, 0), (0, m_pad - M), (0, 0)))

    # Fold the squared norms into the matmul operands (one extra K column/row
    # each) so the kernel's kd branch is a single MXU dot + sqrt.
    oe2 = jnp.sum(oe * oe, axis=-1, keepdims=True)           # (bs, n_pad, 1)
    ones_n = jnp.ones((bs, n_pad, 1), jnp.float32)
    oe_aug = jnp.concatenate([-2.0 * oe, oe2, ones_n], axis=-1)  # (bs, n_pad, De+2)

    teT = jnp.transpose(te, (0, 2, 1))                        # (bs, De, m_pad)
    te2 = jnp.sum(te * te, axis=-1)[:, None, :]               # (bs, 1, m_pad)
    ones_m = jnp.ones((bs, 1, m_pad), jnp.float32)
    teT_aug = jnp.concatenate([teT, ones_m, te2], axis=1)     # (bs, De+2, m_pad)

    tpT = jnp.transpose(tp, (0, 2, 1))                        # (bs, Dp, m_pad)

    K = De + 2
    grid = (bs, n_pad // TM, m_pad // TN)
    kernel = _make_cost_kernel(float(w_kd), float(w_posori), Dp)

    flops = 2 * bs * n_pad * m_pad * (K + Dp) + 6 * bs * n_pad * m_pad
    bytes_accessed = 4 * bs * (n_pad * (K + Dp)
                               + m_pad * (K + Dp)
                               + n_pad * m_pad)

    c_pad = pl.pallas_call(
        kernel,
        out_shape=jax.ShapeDtypeStruct((bs, n_pad, m_pad), jnp.float32),
        grid=grid,
        in_specs=[
            pl.BlockSpec((None, TM, K),  lambda b, i, j: (b, i, 0)),  # oe_aug
            pl.BlockSpec((None, K, TN),  lambda b, i, j: (b, 0, j)),  # teT_aug
            pl.BlockSpec((None, TM, Dp), lambda b, i, j: (b, i, 0)),  # op
            pl.BlockSpec((None, Dp, TN), lambda b, i, j: (b, 0, j)),  # tp^T
        ],
        out_specs=pl.BlockSpec((None, TM, TN), lambda b, i, j: (b, i, j)),
        compiler_params=pltpu.CompilerParams(
            dimension_semantics=("parallel", "parallel", "parallel"),
            vmem_limit_bytes=32 * 1024 * 1024),
        cost_estimate=pl.CostEstimate(
            flops=int(flops),
            transcendentals=int(2 * bs * n_pad * m_pad),
            bytes_accessed=int(bytes_accessed)),
    )(oe_aug, teT_aug, op, tpT)

    # Device-side slice of the lane/sublane padding: only the valid
    # (num_queries, max_mnt) region ever crosses D2H.
    return c_pad[:, :N, :M]


# ---------------------------------------------------------------------------
# Module-equivalent wrapper
# ---------------------------------------------------------------------------
class HungarianMatcherPallas:
    def __init__(self, w_kd: float = 1.0, w_posori: float = 1.0,
                 ret_dec_intermediate: bool = False, use_ori: bool = True):
        assert w_kd != 0 or w_posori != 0, "all costs cant be 0"
        self.w_kd = w_kd
        self.w_posori = w_posori
        self.use_ori = use_ori
        self.ret_dec_intermediate = ret_dec_intermediate
        print('Hungarian: ')
        print('w_kd: ', self.w_kd)
        print('w_posori', self.w_posori)
        print('use ori?', self.use_ori)
        print('inter losses?', self.ret_dec_intermediate)

    def __call__(self, outputs, targets, iter_id=-1):
        kd = outputs['kd_tokens']
        posori = outputs['posori_tokens']
        if self.ret_dec_intermediate:
            kd = kd[iter_id]
            posori = posori[iter_id]
        bs, num_queries = kd.shape[:2]

        out_embs = jnp.asarray(kd, jnp.float32)                    # (bs, nq, De)
        out_posori = jnp.asarray(posori, jnp.float32)              # (bs, nq, Dp)
        tgt_embs = jnp.asarray(targets['local_emb'], jnp.float32)  # (bs, max_mnt, De)
        tgt_posori = jnp.asarray(targets['mnt'], jnp.float32)      # (bs, max_mnt, Dp)
        if not self.use_ori:
            out_posori = out_posori[..., :2]
            tgt_posori = tgt_posori[..., :2]

        # --- Pallas hot path: per-batch (block-diagonal) cost, already sliced
        # on device to (bs, num_queries, max_mnt) before the host transfer.
        C = batched_pairwise_cost(out_embs, tgt_embs, out_posori, tgt_posori,
                                  w_kd=float(self.w_kd),
                                  w_posori=float(self.w_posori))
        C_host = np.asarray(jax.block_until_ready(C))

        num_mnt = np.asarray(targets['num_mnt']).astype(np.int64)

        # TODO(synk): Hungarian assignment (sequential augmenting-path algorithm)
        # has no clean Pallas equivalent; it runs on host via scipy, mirroring
        # the PyTorch module's `.cpu()` + linear_sum_assignment.
        indices = []
        for i in range(bs):
            # Padded target columns carry garbage costs; slicing to the valid
            # :num_mnt[i] region here preserves the original semantics.
            c_i = C_host[i, :num_queries, :int(num_mnt[i])]
            r, c = linear_sum_assignment(c_i)
            indices.append((np.asarray(r, np.int64), np.asarray(c, np.int64)))
        return indices


# ---------------------------------------------------------------------------
# Demo / self-check
# ---------------------------------------------------------------------------
if __name__ == "__main__":
    key = jax.random.PRNGKey(0)
    bs, num_queries, emb_dim, posori_dim, max_mnt = 2, 8, 32, 3, 6

    k1, k2, k3, k4 = jax.random.split(key, 4)
    outputs = {
        "kd_tokens": jax.random.normal(k1, (bs, num_queries, emb_dim), jnp.float32),
        "posori_tokens": jax.random.normal(k2, (bs, num_queries, posori_dim), jnp.float32),
    }
    targets = {
        "local_emb": jax.random.normal(k3, (bs, max_mnt, emb_dim), jnp.float32),
        "mnt": jax.random.normal(k4, (bs, max_mnt, posori_dim), jnp.float32),
        "num_mnt": np.array([5, 3], dtype=np.int32),
    }

    matcher = HungarianMatcherPallas(w_kd=1.0, w_posori=1.0, use_ori=True)
    indices = matcher(outputs, targets)

    # --- reference check of the kernel-computed cost matrix (direct numpy) ---
    C = np.asarray(jax.block_until_ready(batched_pairwise_cost(
        outputs["kd_tokens"], targets["local_emb"],
        outputs["posori_tokens"], targets["mnt"], w_kd=1.0, w_posori=1.0)))

    oe = np.asarray(outputs["kd_tokens"], np.float32)
    op = np.asarray(outputs["posori_tokens"], np.float32)
    te = np.asarray(targets["local_emb"], np.float32)
    tp = np.asarray(targets["mnt"], np.float32)
    ref = (np.sqrt(((oe[:, :, None, :] - te[:, None, :, :]) ** 2).sum(-1))
           + np.sqrt(((op[:, :, None, :] - tp[:, None, :, :]) ** 2).sum(-1)))
    assert C.shape == (bs, num_queries, max_mnt), "device-side slice shape wrong"
    assert np.allclose(C, ref, rtol=1e-4, atol=1e-4), "cost matrix mismatch"

    # --- assignment check (optimal cost must match scipy on the reference C) ---
    assert len(indices) == bs
    for i, (r, c) in enumerate(indices):
        n_i = int(targets["num_mnt"][i])
        assert r.dtype == np.int64 and c.dtype == np.int64
        assert len(r) == n_i and len(c) == n_i
        rr, cc = linear_sum_assignment(ref[i, :, :n_i])
        got_cost = ref[i, :, :n_i][r, c].sum()
        ref_cost = ref[i, :, :n_i][rr, cc].sum()
        assert abs(got_cost - ref_cost) < 1e-3, "assignment cost mismatch"

    print("KERNEL_OK")
</pallas_src>

<mosaic_0001>
module attributes {stable_mosaic.version = 11 : i64} {
  func.func @cost_kernel(%arg0: i32, %arg1: i32, %arg2: i32, %arg3: memref<1x8x34xf32, #tpu.memory_space<vmem>>, %arg4: memref<1x34x128xf32, #tpu.memory_space<vmem>>, %arg5: memref<1x8x3xf32, #tpu.memory_space<vmem>>, %arg6: memref<1x3x128xf32, #tpu.memory_space<vmem>>, %arg7: memref<1x8x128xf32, #tpu.memory_space<vmem>>) attributes {dimension_semantics = [#tpu.dimension_semantics<parallel>, #tpu.dimension_semantics<parallel>, #tpu.dimension_semantics<parallel>], iteration_bounds = array<i64: 2, 1, 1>, scalar_prefetch = 0 : i64, scratch_operands = 0 : i64, tpu.core_type = #tpu.core_type<tc>, window_params = [{transform_indices = @transform_0, window_bounds = array<i64: 1, 8, 34>}, {transform_indices = @transform_1, window_bounds = array<i64: 1, 34, 128>}, {transform_indices = @transform_2, window_bounds = array<i64: 1, 8, 3>}, {transform_indices = @transform_3, window_bounds = array<i64: 1, 3, 128>}, {transform_indices = @transform_4, window_bounds = array<i64: 1, 8, 128>}]} {
    %c0 = arith.constant 0 : index
    %c0_0 = arith.constant 0 : index
    %c0_1 = arith.constant 0 : index
    %0 = vector.load %arg3[%c0, %c0_0, %c0_1] : memref<1x8x34xf32, #tpu.memory_space<vmem>>, vector<1x8x34xf32>
    %1 = vector.shape_cast %0 : vector<1x8x34xf32> to vector<8x34xf32>
    %c0_2 = arith.constant 0 : index
    %c0_3 = arith.constant 0 : index
    %c0_4 = arith.constant 0 : index
    %2 = vector.load %arg4[%c0_2, %c0_3, %c0_4] : memref<1x34x128xf32, #tpu.memory_space<vmem>>, vector<1x34x128xf32>
    %3 = vector.shape_cast %2 : vector<1x34x128xf32> to vector<34x128xf32>
    %cst = arith.constant dense<0.000000e+00> : vector<8x128xf32>
    %4 = tpu.matmul %1, %3, %cst {dimension_numbers = #tpu.dot_dimension_numbers<[1], [0], [0], [1], [0, 0, 1, 1], [], []>} : vector<8x34xf32>, vector<34x128xf32>, vector<8x128xf32> -> vector<8x128xf32>
    %cst_5 = arith.constant 0.000000e+00 : f32
    %5 = vector.broadcast %cst_5 : f32 to vector<8x128xf32>
    %6 = arith.maximumf %4, %5 : vector<8x128xf32>
    %7 = math.sqrt %6 : vector<8x128xf32>
    %cst_6 = arith.constant 1.000000e+00 : f32
    %8 = vector.broadcast %cst_6 : f32 to vector<8x128xf32>
    %9 = arith.mulf %8, %7 : vector<8x128xf32>
    %c0_7 = arith.constant 0 : index
    %c0_8 = arith.constant 0 : index
    %c0_9 = arith.constant 0 : index
    %10 = vector.load %arg5[%c0_7, %c0_8, %c0_9] : memref<1x8x3xf32, #tpu.memory_space<vmem>>, vector<1x8x3xf32>
    %11 = vector.shape_cast %10 : vector<1x8x3xf32> to vector<8x3xf32>
    %c0_10 = arith.constant 0 : index
    %c0_11 = arith.constant 0 : index
    %c0_12 = arith.constant 0 : index
    %12 = vector.load %arg6[%c0_10, %c0_11, %c0_12] : memref<1x3x128xf32, #tpu.memory_space<vmem>>, vector<1x3x128xf32>
    %13 = vector.shape_cast %12 : vector<1x3x128xf32> to vector<3x128xf32>
    %14 = vector.extract_strided_slice %11 {offsets = [0, 0], sizes = [8, 1], strides = [1, 1]} : vector<8x3xf32> to vector<8x1xf32>
    %15 = vector.extract_strided_slice %13 {offsets = [0, 0], sizes = [1, 128], strides = [1, 1]} : vector<3x128xf32> to vector<1x128xf32>
    %16 = vector.broadcast %14 : vector<8x1xf32> to vector<8x128xf32>
    %17 = vector.broadcast %15 : vector<1x128xf32> to vector<8x128xf32>
    %18 = arith.subf %16, %17 : vector<8x128xf32>
    %19 = arith.mulf %18, %18 : vector<8x128xf32>
    %20 = vector.extract_strided_slice %11 {offsets = [0, 1], sizes = [8, 1], strides = [1, 1]} : vector<8x3xf32> to vector<8x1xf32>
    %21 = vector.extract_strided_slice %13 {offsets = [1, 0], sizes = [1, 128], strides = [1, 1]} : vector<3x128xf32> to vector<1x128xf32>
    %22 = vector.broadcast %20 : vector<8x1xf32> to vector<8x128xf32>
    %23 = vector.broadcast %21 : vector<1x128xf32> to vector<8x128xf32>
    %24 = arith.subf %22, %23 : vector<8x128xf32>
    %25 = arith.mulf %24, %24 : vector<8x128xf32>
    %26 = arith.addf %19, %25 : vector<8x128xf32>
    %27 = vector.extract_strided_slice %11 {offsets = [0, 2], sizes = [8, 1], strides = [1, 1]} : vector<8x3xf32> to vector<8x1xf32>
    %28 = vector.extract_strided_slice %13 {offsets = [2, 0], sizes = [1, 128], strides = [1, 1]} : vector<3x128xf32> to vector<1x128xf32>
    %29 = vector.broadcast %27 : vector<8x1xf32> to vector<8x128xf32>
    %30 = vector.broadcast %28 : vector<1x128xf32> to vector<8x128xf32>
    %31 = arith.subf %29, %30 : vector<8x128xf32>
    %32 = arith.mulf %31, %31 : vector<8x128xf32>
    %33 = arith.addf %26, %32 : vector<8x128xf32>
    %34 = math.sqrt %33 : vector<8x128xf32>
    %cst_13 = arith.constant 1.000000e+00 : f32
    %35 = vector.broadcast %cst_13 : f32 to vector<8x128xf32>
    %36 = arith.mulf %35, %34 : vector<8x128xf32>
    %37 = arith.addf %9, %36 : vector<8x128xf32>
    %c0_14 = arith.constant 0 : index
    %c0_15 = arith.constant 0 : index
    %c0_16 = arith.constant 0 : index
    %38 = vector.load %arg7[%c0_14, %c0_15, %c0_16] : memref<1x8x128xf32, #tpu.memory_space<vmem>>, vector<1x8x128xf32>
    %39 = vector.shape_cast %38 : vector<1x8x128xf32> to vector<8x128xf32>
    %40 = vector.shape_cast %37 : vector<8x128xf32> to vector<1x8x128xf32>
    tpu.vector_store %arg7[%c0_14, %c0_15, %c0_16], %40 {strides = array<i32>} : memref<1x8x128xf32, #tpu.memory_space<vmem>>, vector<1x8x128xf32>,
    return
  }
  func.func @transform_0(%arg0: i32, %arg1: i32, %arg2: i32) -> (i32, i32, i32) {
    %c0_i32 = arith.constant 0 : i32
    %c0_i32_0 = arith.constant 0 : i32
    return %arg0, %arg1, %c0_i32 : i32, i32, i32
  }
  func.func @transform_1(%arg0: i32, %arg1: i32, %arg2: i32) -> (i32, i32, i32) {
    %c0_i32 = arith.constant 0 : i32
    %c0_i32_0 = arith.constant 0 : i32
    return %arg0, %c0_i32, %arg2 : i32, i32, i32
  }
  func.func @transform_2(%arg0: i32, %arg1: i32, %arg2: i32) -> (i32, i32, i32) {
    %c0_i32 = arith.constant 0 : i32
    %c0_i32_0 = arith.constant 0 : i32
    return %arg0, %arg1, %c0_i32 : i32, i32, i32
  }
  func.func @transform_3(%arg0: i32, %arg1: i32, %arg2: i32) -> (i32, i32, i32) {
    %c0_i32 = arith.constant 0 : i32
    %c0_i32_0 = arith.constant 0 : i32
    return %arg0, %c0_i32, %arg2 : i32, i32, i32
  }
  func.func @transform_4(%arg0: i32, %arg1: i32, %arg2: i32) -> (i32, i32, i32) {
    %c0_i32 = arith.constant 0 : i32
    return %arg0, %arg1, %arg2 : i32, i32, i32
  }
}

</mosaic_0001>

<bundles_post_ra>
// kernel: batched_pairwise_cost.1
= control target key start
LH: loop header
LB: loop body
LE: loop exit
PB: predicated region body
PF: predicated region fallthrough
CT: control target
= control target key end

     0   :  { %s650_s15 = smov 0   ;;  %s652_s16 = smov 0   ;;  %s702_s0 = inlined_call_operand.vmem [shape: f32[2,8,34], index: 0, kind: input, shape index: {}]   ;;  %s703_s1 = inlined_call_operand.vmem [shape: f32[2,34,128], index: 1, kind: input, shape index: {}]   ;;  %s704_s2 = inlined_call_operand.vmem [shape: f32[2,8,3], index: 2, kind: input, shape index: {}]   ;;  %s705_s3 = inlined_call_operand.vmem [shape: f32[2,3,128], index: 3, kind: input, shape index: {}]   ;;  %s706_s4 = inlined_call_operand.vmem [shape: f32[2,8,128], index: 4, kind: output, shape index: {}]  }
   0x1   :  { %s654_s17 = smov 0  }
   0x2 LB: > { %s33_s18 = sadd.s32 1, %s616_s16  ;;  %p552_p0 = scmp.ge.s32.totalorder %s620_s17, 1  ;;  %s620_s17 = sphi %s654_s17, %s14_s17   ;;  %s616_s16 = sphi %s652_s16, %s708_s16   ;;  %s612_s15 = sphi %s650_s15, %s707_s15  }
   0x3   : > { %p35_p1 = scmp.ge.s32.totalorder %s33_s18, 2  ;;  %p232_p2 = scmp.lt.s32.totalorder %s620_s17, 3 }
   0x5   : > { %s710_s18 = smov (%p35_p1, %s33_s18), 0  ;;  %p233_p3 = pnand %p552_p0, %p232_p2 }
   0x6   : > { %p287_p4 = scmp.lt.s32.totalorder (!%p233_p3), %s612_s15, 1 }
   0x7   : > { %236 = sbr.rel (%p233_p3) target bundleno = 178 (0xb2), region = 36 }
   0xc   : > { %v622_v0 = vmov 0   ;;  %v623_v1 = vmov 2   ;;  %s712_s15 = smov (!%p287_p4, %s612_s15), 1  ;;  %vm336_vm0 = vcmask 1041408   ;;  %vm332_vm1 = vcmask 277504  }
   0xd   : > { %590 = vset.pattern.permute.xlu0 %v622_v0  ;;  %592 = vset.pattern.permute.xlu1 %v623_v1  ;;  %s671_s19 = sshll.u32 %s712_s15, 3  ;;  %s562_s20 = smul.u32 40, %s712_s15  ;;  %v624_v9 = vmov 1  }
   0xe   : > { %s308_s23 = scalar_lea.vmem %s704_s2, %s671_s19  ;;  %s293_s29 = scalar_lea.vmem %s702_s0, %s671_s19 }
   0xf   : > { %v373_v2 = vld [vmem:[%s308_s23] sm:$0xff]  ;;  %s301_s26 = scalar_lea.vmem %s703_s1, %s562_s20  ;;  %s556_s30 = sshll.u32 %s712_s15, 2 }
  0x10   : > { %377 = vperm.xlu0 %590, %v373_v2   ;;  %v331_v3 = vld [vmem:[%s301_s26 + $0x20] sm:$0x3]  ;;  %v330_v4 = vld [vmem:[%s301_s26 + $0x18] sm:$0xff]  ;;  %392 = vperm.xlu1 %592, %v373_v2   ;;  %v329_v5 = vld [vmem:[%s301_s26 + $0x10] sm:$0xff]  ;;  %s315_s7 = scalar_lea.vmem %s705_s3, %s556_s30  ;;  %s325_s10 = scalar_lea.vmem %s706_s4, %s671_s19 }
  0x11   : > { %558 = vmatpush.msk.msra.mxu0 %vm336_vm0, %v331_v3  ;;  %v328_v6 = vld [vmem:[%s301_s26 + $0x8] sm:$0xff]  ;;  %v327_v7 = vld [vmem:[%s301_s26] sm:$0xff] }
  0x12   : > { %v326_v8 = vld [vmem:[%s293_s29] sm:$0xff] }
  0x13   : > { %352 = vmatpush.msra.mxu0 %v330_v4  ;;  %v374_v11 = vld [vmem:[%s315_s7] sm:$0x7] }
  0x14   : > { %v380_v12 = vperm.slane %v374_v11, 0  ;;  %v395_v13 = vperm.slane %v374_v11, 2  ;;  %v387_v15 = vperm.slane %v374_v11, 1 }
  0x15   : > { %353 = vmatpush.msra.mxu0 %v329_v5 }
  0x17   : > { %354 = vmatpush.msra.mxu0 %v328_v6 }
  0x18   : > { %591 = vset.pattern.permute.xlu0 %v624_v9 }
  0x19   : > { %355 = vmatpush.msra.mxu0 %v327_v7  ;;  %384 = vperm.xlu0 %591, %v373_v2  }
  0x1a   : > { %559 = vmatmul.msk.f32.vlgmr.msra.gmra.mxu0 %vm332_vm1, %v326_v8 }
  0x21   : > { %593 = vset.pattern.permute.xlu0 %v623_v1 }
  0x82   : > { %v378_v10 = vpop.permute.xlu0 %377  ;;  %v393_v14 = vpop.permute.xlu1 %392 }
  0x83   : > { %v381_v16 = vsub.f32 %v378_v10, %v380_v12  ;;  %v396_v17 = vsub.f32 %v393_v14, %v395_v13 }
  0x85   : > { %v382_v20 = vmul.f32 %v381_v16, %v381_v16  ;;  %v397_v22 = vmul.f32 %v396_v17, %v396_v17 }
  0x8b   : > { %v385_v18 = vpop.permute.xlu0 %384 }
  0x8c   : > { %v388_v19 = vsub.f32 %v385_v18, %v387_v15 }
  0x8e   : > { %v389_v21 = vmul.f32 %v388_v19, %v388_v19 }
  0x90   : > { %v390_v23 = vadd.f32 %v389_v21, %v382_v20 }
  0x92   : > { %v398_v24 = vadd.f32 %v397_v22, %v390_v23 }
  0x94   : > { %594 = vrsqrt.f32 %v398_v24  ;;  %vm406_vm2 = vcmp.eq.f32.partialorder %v398_v24, inf  ;;  %v409_v42 = vand.u32 2147483648, %v398_v24  ;;  %vm408_vm4 = vcmp.eq.f32.partialorder %v398_v24, 0.0 }
  0x97   : > { %v357_v25 = vpop.f32.mrf.mxu0 }
  0x98   : > { %v360_v26 = vmax.f32 %v357_v25, 0.0 }
  0x9a   : > { %v595_v27 = vpop.eup %594  ;;  %596 = vrsqrt.f32 %v360_v26  ;;  %vm368_vm3 = vcmp.eq.f32.partialorder %v360_v26, inf  ;;  %v371_v43 = vand.u32 2147483648, %v360_v26  ;;  %vm370_vm5 = vcmp.eq.f32.partialorder %v360_v26, 0.0 }
  0x9b   : > { %v400_v28 = vmul.f32 %v595_v27, %v398_v24 }
  0x9d   : > { %v401_v29 = vmul.f32 %v595_v27, %v400_v28 }
  0x9f   : > { %v402_v30 = vmul.f32 0.5, %v401_v29 }
  0xa0   : > { %v597_v31 = vpop.eup %596 }
  0xa1   : > { %v403_v32 = vsub.f32 1.5, %v402_v30  ;;  %v362_v33 = vmul.f32 %v597_v31, %v360_v26 }
  0xa3   : > { %v404_v34 = vmul.f32 %v595_v27, %v403_v32  ;;  %v363_v35 = vmul.f32 %v597_v31, %v362_v33 }
  0xa5   : > { %v364_v36 = vmul.f32 0.5, %v363_v35  ;;  %v405_v37 = vmul.f32 %v404_v34, %v398_v24 }
  0xa7   : > { %v365_v38 = vsub.f32 1.5, %v364_v36  ;;  %v407_v40 = vsel %vm406_vm2, %v398_v24, %v405_v37 }
  0xa8   : > { %v410_v46 = vsel %vm408_vm4, %v409_v42, %v407_v40 }
  0xa9   : > { %v366_v39 = vmul.f32 %v597_v31, %v365_v38 }
  0xab   : > { %v367_v41 = vmul.f32 %v366_v39, %v360_v26 }
  0xad   : > { %v369_v44 = vsel %vm368_vm3, %v360_v26, %v367_v41 }
  0xae   : > { %v372_v45 = vsel %vm370_vm5, %v371_v43, %v369_v44 }
  0xaf   : > { %v411_v47 = vadd.f32 %v410_v46, %v372_v45 }
  0xb1   : > { %412 = vst [vmem:[%s325_s10] sm:$0xff] %v411_v47 }
  0xb2 PF: > { %s14_s17 = sadd.s32 1, %s620_s17   ;;  %s707_s15 = smov %s616_s16 }
  0xb3   : > { %p11_p5 = scmp.ge.s32.totalorder %s14_s17, 4   ;;  %s708_s16 = smov %s710_s18 }
  0xb5   :  { %13 = sbr.rel (!%p11_p5) target bundleno = 2 (0x2), region = 75 }

</bundles_post_ra>
